<compile_context>
chip_gen: v5e
topology: v5e:2x2
jax: 0.10.0
libtpu: 0.0.40
codegen_flags: <defaults>
</compile_context>

<pallas_src>
import functools

import jax
import jax.numpy as jnp
from jax import lax
from jax.experimental import pallas as pl
from jax.experimental.pallas import tpu as pltpu

# ---- module hyper-parameters (match TemporalBlock.__init__ args) ----
N_INPUTS = 4          # n_inputs
N_OUTPUTS = 8         # n_outputs
KSIZE = 3             # kernel_size
STRIDE = 1            # stride (TCN convention; kernel assumes 1)
DILATION = 2          # dilation
PAD = (KSIZE - 1) * DILATION   # padding (causal TCN convention)
BATCH = 2
SEQ_LEN = 16

LANES = 128           # lane-dense padded width
CB = 8                # sublane block


def _temporal_block_kernel(x_ref, c_ref, o_ref, *, K, dil, Cout):
    # x_ref: (CB, LANES)       x, channels (Cin zero-padded to 8) on sublanes,
    #                          batch*time zero-padded to 128 lanes.
    # c_ref: (48, LANES)       packed constants:
    #   rows [0, 2*Cout)            : fused conv1 + 1x1-downsample weight (lanes 0..31)
    #   rows [2*Cout, 3*Cout)       : conv2 weight                         (lanes 0..31)
    #   rows [3*Cout, 3*Cout+CB)    : ones block (row 0 = 1 on valid lanes)
    #   then (K-1) blocks of CB rows: causal masks for shifts (K-1-j)*dil, j=0..K-2
    # o_ref: (Cout, LANES)     output, single full-vreg store.
    n_stack = (K + 1) * CB

    w1 = c_ref[0:2 * Cout, 0:n_stack]                 # (16, 32) biases folded (col 24)
    w2 = c_ref[2 * Cout:3 * Cout, 0:n_stack]          # (8, 32)  bias folded
    r = 3 * Cout
    ones_blk = c_ref[r:r + CB, :]                     # (8, 128)
    r += CB
    mask_blks = []
    for _ in range(K - 1):
        mask_blks.append(c_ref[r:r + CB, :])          # (8, 128) each
        r += CB

    def stack_taps(v):
        # Stack the K causal taps (sublane blocks) + the bias "ones" block.
        blocks = []
        for j in range(K - 1):
            s = (K - 1 - j) * dil
            blocks.append(pltpu.roll(v, shift=s, axis=1) * mask_blks[j])
        blocks.append(v)          # shift-0 tap (already valid / zero on pad lanes)
        blocks.append(ones_blk)   # bias row block
        return jnp.concatenate(blocks, axis=0)        # (32, 128)

    x = x_ref[...]                                                        # (8, 128)

    # conv1 + bias + 1x1 residual downsample + bias : ONE matmul
    z = jnp.dot(w1, stack_taps(x), preferred_element_type=jnp.float32)    # (16, 128)
    h = jnp.maximum(z[0:Cout, :], 0.0)                # relu1 (dropout1 = identity)
    res = z[Cout:2 * Cout, :]                         # residual branch

    # conv2 + bias : ONE matmul
    y = jnp.dot(w2, stack_taps(h), preferred_element_type=jnp.float32)    # (8, 128)

    # relu2 (dropout2 = identity), add residual, final relu — single store.
    o_ref[...] = jnp.maximum(jnp.maximum(y, 0.0) + res, 0.0)


def _pack_constants(w1, b1, w2, b2, wd, bd, *, B, L):
    """Pack fused weights (biases folded) + causal masks into one (48,128) slab."""
    Cout, Cin, K = w1.shape
    n_stack = (K + 1) * CB

    # fused conv1 + downsample weight, (2*Cout, n_stack)
    W1f = jnp.zeros((2 * Cout, n_stack), jnp.float32)
    for j in range(K):
        W1f = W1f.at[0:Cout, j * CB:j * CB + Cin].set(w1[:, :, j])
    W1f = W1f.at[0:Cout, K * CB].set(b1)                              # conv1 bias
    W1f = W1f.at[Cout:, (K - 1) * CB:(K - 1) * CB + Cin].set(wd[:, :, 0])
    W1f = W1f.at[Cout:, K * CB].set(bd)                               # downsample bias

    # conv2 weight, (Cout, n_stack)
    W2f = jnp.zeros((Cout, n_stack), jnp.float32)
    for j in range(K):
        W2f = W2f.at[:, j * CB:j * CB + Cout].set(w2[:, :, j])
    W2f = W2f.at[:, K * CB].set(b2)                                   # conv2 bias

    # causal masks over the padded lane axis (batches concatenated along lanes)
    lane = jnp.arange(LANES)
    valid = lane < B * L
    t = lane % L

    def mask(s):
        return jnp.where(valid & (t >= s), 1.0, 0.0).astype(jnp.float32)

    ones_blk = jnp.zeros((CB, LANES), jnp.float32).at[0, :].set(mask(0))

    rows = 3 * Cout + CB + (K - 1) * CB               # 48 for Cout=8, K=3
    slab = jnp.zeros((rows, LANES), jnp.float32)
    slab = slab.at[0:2 * Cout, 0:n_stack].set(W1f)
    slab = slab.at[2 * Cout:3 * Cout, 0:n_stack].set(W2f)
    r = 3 * Cout
    slab = slab.at[r:r + CB, :].set(ones_blk)
    r += CB
    for j in range(K - 1):
        s = (K - 1 - j) * DILATION
        slab = slab.at[r:r + CB, :].set(jnp.broadcast_to(mask(s), (CB, LANES)))
        r += CB
    return slab


def temporal_block_forward(x, w1, b1, w2, b2, wd, bd):
    """x: (B, Cin, L) float32 (PyTorch NCL layout). Returns (B, Cout, L)."""
    assert STRIDE == 1, "kernel assumes stride 1 (TCN)"
    B, Cin, L = x.shape
    Cout, _, K = w1.shape
    assert Cout % CB == 0 and Cin <= CB
    assert B * L <= LANES and (K - 1) * DILATION < L

    # --- wrapper-side layout plumbing (all tiny) ---
    x_t = jnp.transpose(x, (1, 0, 2)).reshape(Cin, B * L)             # (Cin, B*L)
    x_slab = jnp.zeros((CB, LANES), jnp.float32).at[:Cin, :B * L].set(x_t)
    c_slab = _pack_constants(w1, b1, w2, b2, wd, bd, B=B, L=L)        # (48, 128)

    kernel = functools.partial(_temporal_block_kernel, K=K, dil=DILATION, Cout=Cout)

    # Single grid-less invocation, 2 input DMAs, 1 lane-dense output store.
    out128 = pl.pallas_call(
        kernel,
        out_shape=jax.ShapeDtypeStruct((Cout, LANES), jnp.float32),
    )(x_slab, c_slab)

    # (Cout, 128) -> (B, Cout, L)
    return jnp.transpose(out128[:, :B * L].reshape(Cout, B, L), (1, 0, 2))


# ---------------- deterministic parameter construction ----------------
def make_params(key):
    """Weight-normalized conv weights exactly as weight_norm would build them:
    w = g * v / ||v|| with the norm over (in_channels, kernel) per out channel."""
    ks = jax.random.split(key, 8)

    def weight_norm_weight(kv, kg, shape):
        v = 0.01 * jax.random.normal(kv, shape, jnp.float32)
        g = 0.5 + jax.random.uniform(kg, (shape[0],), jnp.float32)
        norm = jnp.sqrt(jnp.sum(v * v, axis=(1, 2), keepdims=True)) + 1e-12
        return g[:, None, None] * v / norm

    w1 = weight_norm_weight(ks[0], ks[1], (N_OUTPUTS, N_INPUTS, KSIZE))
    b1 = 0.1 * jax.random.normal(ks[2], (N_OUTPUTS,), jnp.float32)
    w2 = weight_norm_weight(ks[3], ks[4], (N_OUTPUTS, N_OUTPUTS, KSIZE))
    b2 = 0.1 * jax.random.normal(ks[5], (N_OUTPUTS,), jnp.float32)
    # downsample present because N_INPUTS != N_OUTPUTS
    wd = 0.01 * jax.random.normal(ks[6], (N_OUTPUTS, N_INPUTS, 1), jnp.float32)
    bd = 0.1 * jax.random.normal(ks[7], (N_OUTPUTS,), jnp.float32)
    return w1, b1, w2, b2, wd, bd


# ---------------- pure-JAX reference (mirrors the PyTorch forward) ----------------
def ref_forward(x, w1, b1, w2, b2, wd, bd):
    def causal_conv(inp, w, b):
        y = lax.conv_general_dilated(
            inp, w, window_strides=(STRIDE,), padding=[(PAD, PAD)],
            rhs_dilation=(DILATION,), dimension_numbers=('NCH', 'OIH', 'NCH'))
        y = y + b[None, :, None]
        return y[:, :, :-PAD]                    # Chomp1d(PAD)

    h = jax.nn.relu(causal_conv(x, w1, b1))      # dropout = identity (eval)
    out = jax.nn.relu(causal_conv(h, w2, b2))
    res = lax.conv_general_dilated(
        x, wd, window_strides=(1,), padding=[(0, 0)],
        dimension_numbers=('NCH', 'OIH', 'NCH')) + bd[None, :, None]
    return jax.nn.relu(out + res)


if __name__ == "__main__":
    key = jax.random.PRNGKey(0)
    kx, kp = jax.random.split(key)
    x = jax.random.normal(kx, (BATCH, N_INPUTS, SEQ_LEN), jnp.float32)
    params = make_params(kp)

    y = temporal_block_forward(x, *params)
    y = jax.block_until_ready(y)

    y_ref = ref_forward(x, *params)
    assert y.shape == (BATCH, N_OUTPUTS, SEQ_LEN), y.shape
    assert jnp.allclose(y, y_ref, atol=1e-4, rtol=1e-4), (
        float(jnp.max(jnp.abs(y - y_ref))))

    print("KERNEL_OK")
</pallas_src>

<mosaic_0001>
module attributes {stable_mosaic.version = 11 : i64} {
  func.func @_temporal_block_kernel(%arg0: memref<8x128xf32, #tpu.memory_space<vmem>>, %arg1: memref<48x128xf32, #tpu.memory_space<vmem>>, %arg2: memref<8x128xf32, #tpu.memory_space<vmem>>) attributes {dimension_semantics = [], scalar_prefetch = 0 : i64, scratch_operands = 0 : i64, tpu.core_type = #tpu.core_type<tc>} {
    %c0 = arith.constant 0 : index
    %c0_0 = arith.constant 0 : index
    %0 = vector.load %arg1[%c0, %c0_0] : memref<48x128xf32, #tpu.memory_space<vmem>>, vector<16x32xf32>
    %c16 = arith.constant 16 : index
    %c0_1 = arith.constant 0 : index
    %1 = vector.load %arg1[%c16, %c0_1] : memref<48x128xf32, #tpu.memory_space<vmem>>, vector<8x32xf32>
    %c24 = arith.constant 24 : index
    %c0_2 = arith.constant 0 : index
    %2 = vector.load %arg1[%c24, %c0_2] : memref<48x128xf32, #tpu.memory_space<vmem>>, vector<8x128xf32>
    %c32 = arith.constant 32 : index
    %c0_3 = arith.constant 0 : index
    %3 = vector.load %arg1[%c32, %c0_3] : memref<48x128xf32, #tpu.memory_space<vmem>>, vector<8x128xf32>
    %c40 = arith.constant 40 : index
    %c0_4 = arith.constant 0 : index
    %4 = vector.load %arg1[%c40, %c0_4] : memref<48x128xf32, #tpu.memory_space<vmem>>, vector<8x128xf32>
    %c0_5 = arith.constant 0 : index
    %c0_6 = arith.constant 0 : index
    %5 = vector.load %arg0[%c0_5, %c0_6] : memref<8x128xf32, #tpu.memory_space<vmem>>, vector<8x128xf32>
    %c4_i32 = arith.constant 4 : i32
    %6 = tpu.dynamic_rotate %5 by %c4_i32 dim 1 : vector<8x128xf32>, i32 -> vector<8x128xf32>
    %7 = arith.mulf %6, %3 : vector<8x128xf32>
    %c2_i32 = arith.constant 2 : i32
    %8 = tpu.dynamic_rotate %5 by %c2_i32 dim 1 : vector<8x128xf32>, i32 -> vector<8x128xf32>
    %9 = arith.mulf %8, %4 : vector<8x128xf32>
    %10 = tpu.concatenate %7, %9, %5, %2 in 0 : vector<8x128xf32>, vector<8x128xf32>, vector<8x128xf32>, vector<8x128xf32> -> vector<32x128xf32>
    %cst = arith.constant dense<0.000000e+00> : vector<16x128xf32>
    %11 = tpu.matmul %0, %10, %cst {dimension_numbers = #tpu.dot_dimension_numbers<[1], [0], [0], [1], [0, 0, 1, 1], [], []>} : vector<16x32xf32>, vector<32x128xf32>, vector<16x128xf32> -> vector<16x128xf32>
    %12 = vector.extract_strided_slice %11 {offsets = [0, 0], sizes = [8, 128], strides = [1, 1]} : vector<16x128xf32> to vector<8x128xf32>
    %cst_7 = arith.constant 0.000000e+00 : f32
    %13 = vector.broadcast %cst_7 : f32 to vector<8x128xf32>
    %14 = arith.maximumf %12, %13 : vector<8x128xf32>
    %15 = vector.extract_strided_slice %11 {offsets = [8, 0], sizes = [8, 128], strides = [1, 1]} : vector<16x128xf32> to vector<8x128xf32>
    %c4_i32_8 = arith.constant 4 : i32
    %16 = tpu.dynamic_rotate %14 by %c4_i32_8 dim 1 : vector<8x128xf32>, i32 -> vector<8x128xf32>
    %17 = arith.mulf %16, %3 : vector<8x128xf32>
    %c2_i32_9 = arith.constant 2 : i32
    %18 = tpu.dynamic_rotate %14 by %c2_i32_9 dim 1 : vector<8x128xf32>, i32 -> vector<8x128xf32>
    %19 = arith.mulf %18, %4 : vector<8x128xf32>
    %20 = tpu.concatenate %17, %19, %14, %2 in 0 : vector<8x128xf32>, vector<8x128xf32>, vector<8x128xf32>, vector<8x128xf32> -> vector<32x128xf32>
    %cst_10 = arith.constant dense<0.000000e+00> : vector<8x128xf32>
    %21 = tpu.matmul %1, %20, %cst_10 {dimension_numbers = #tpu.dot_dimension_numbers<[1], [0], [0], [1], [0, 0, 1, 1], [], []>} : vector<8x32xf32>, vector<32x128xf32>, vector<8x128xf32> -> vector<8x128xf32>
    %cst_11 = arith.constant 0.000000e+00 : f32
    %22 = vector.broadcast %cst_11 : f32 to vector<8x128xf32>
    %23 = arith.maximumf %21, %22 : vector<8x128xf32>
    %24 = arith.addf %23, %15 : vector<8x128xf32>
    %cst_12 = arith.constant 0.000000e+00 : f32
    %25 = vector.broadcast %cst_12 : f32 to vector<8x128xf32>
    %26 = arith.maximumf %24, %25 : vector<8x128xf32>
    %c0_13 = arith.constant 0 : index
    %c0_14 = arith.constant 0 : index
    %27 = vector.load %arg2[%c0_13, %c0_14] : memref<8x128xf32, #tpu.memory_space<vmem>>, vector<8x128xf32>
    tpu.vector_store %arg2[%c0_13, %c0_14], %26 {strides = array<i32>} : memref<8x128xf32, #tpu.memory_space<vmem>>, vector<8x128xf32>,
    return
  }
}

</mosaic_0001>

<bundles_post_ra>
// kernel: tpu_custom_call.1
= control target key start
LH: loop header
LB: loop body
LE: loop exit
PB: predicated region body
PF: predicated region fallthrough
CT: control target
= control target key end

     0   :  { %7 = vsyncpa [#allocation3], 0  ;;  %s263_s0 = inlined_call_operand.hbm [shape: f32[8,128], index: 0, kind: input, shape index: {}]   ;;  %s264_s1 = inlined_call_operand.hbm [shape: f32[48,128], index: 1, kind: input, shape index: {}]   ;;  %s265_s2 = inlined_call_operand.hbm [shape: f32[8,128], index: 2, kind: output, shape index: {}]  }
   0x1   :  { %8 = vsyncpa [#allocation6], 0 }
   0x2   :  { %9 = vsyncpa [#allocation4], 0  ;;  %s15_s11 = sshll.u32 %s263_s0, 4  ;;  %s229_s12 = smov [#allocation2]   ;;  %s16_s11 = int_to_ptr.hbm [resolvable:$true] %s15_s11 }
   0x3   :  { %s17_s13 = sshll.u32 %s229_s12, 4  ;;  %s25_s16 = sshll.u32 %s264_s1, 4  ;;  %s18_s13 = int_to_ptr.vmem [resolvable:$true] %s17_s13  ;;  %s26_s16 = int_to_ptr.hbm [resolvable:$true] %s25_s16 }
   0x4   :  { %20 = dma.hbm_to_vmem [thread:$0]  %s16_s11, 128, %s18_s13, [#allocation3]  }
   0x5   :  { %s230_s17 = smov [#allocation5]   ;;  %s231_s19 = smov 128  }
   0x6   :  { %s27_s18 = sshll.u32 %s230_s17, 4  ;;  %s232_s20 = smov 8   ;;  %s28_s18 = int_to_ptr.vmem [resolvable:$true] %s27_s18 }
   0x7   :  { %33 = dma.hbm_to_vmem [thread:$0]  %s26_s16, 768, %s28_s18, [#allocation6], %s231_s19, %s231_s19, %s232_s20  }
   0x8   :  { %223 = dma.done.wait [#allocation3], 128  }
   0x9   :  { %224 = vsyncadd [#allocation3], 4294967168 }
   0xa   :  { %225 = dma.done.wait [#allocation6], 768  }
   0xb   :  { %226 = vsyncadd [#allocation6], 4294966528  ;;  %v48_v0 = vld [vmem:[#allocation2] sm:$0xff]  ;;  %s233_s0 = smov 2   ;;  %s234_s1 = smov 4   ;;  %v47_v2 = vld [vmem:[#allocation5 + $0x28] sm:$0xff] }
   0xc   :  { %v45_v1 = vld [vmem:[#allocation5 + $0x18] sm:$0xff]  ;;  %52 = vrot.lane.b32.xlu0 %v48_v0, %s233_s0  ;;  %v46_v5 = vld [vmem:[#allocation5 + $0x20] sm:$0xff]  ;;  %vm55_vm0 = vcmask 261120   ;;  %v43_v11 = vld [vmem:[#allocation5 + $0x8] sm:$0xff]  ;;  %s235_s21 = smov [#allocation7]   ;;  %s126_s25 = sshll.u32 %s265_s2, 4  ;;  %s127_s25 = int_to_ptr.hbm [resolvable:$true] %s126_s25 }
   0xd   :  { %74 = vmatpush.msra.mxu0 %v45_v1  ;;  %140 = vmatpush.msra.mxu2 %v45_v1  ;;  %v42_v8 = vld [vmem:[#allocation5] sm:$0xff]  ;;  %v44_v16 = vld [vmem:[#allocation5 + $0x10] sm:$0xff]  ;;  %s124_s22 = sshll.u32 %s235_s21, 4  ;;  %s125_s22 = int_to_ptr.vmem [resolvable:$true] %s124_s22 }
   0xe   :  { %107 = vmatpush.msra.mxu1 %v45_v1 }
   0xf   :  { %75 = vmatpush.msra.mxu0 %v48_v0  ;;  %141 = vmatpush.msra.mxu2 %v48_v0 }
  0x14   :  { %49 = vrot.lane.b32.xlu0 %v48_v0, %s234_s1 }
  0x7e   :  { %v53_v3 = vpop.permute.xlu0 %52 }
  0x7f   :  { %v54_v4 = vmul.f32 %v53_v3, %v47_v2 }
  0x81   :  { %76 = vmatpush.msra.mxu0 %v54_v4  ;;  %142 = vmatpush.msra.mxu2 %v54_v4 }
  0x86   :  { %v50_v6 = vpop.permute.xlu0 %49 }
  0x87   :  { %v51_v7 = vmul.f32 %v50_v6, %v46_v5 }
  0x89   :  { %77 = vmatpush.msra.mxu0 %v51_v7  ;;  %143 = vmatpush.msra.mxu2 %v51_v7 }
  0x8a   :  { %137 = vmatmul.msk.f32.vlgmr.msra.gmra.mxu0 %vm55_vm0, %v42_v8  ;;  %138 = vmatmul.msk.f32.vlgmr.msra.gmra.mxu2 %vm55_vm0, %v43_v11 }
 0x107   :  { %v79_v9 = vpop.f32.mrf.mxu0 }
 0x108   :  { %v85_v10 = vmax.f32 %v79_v9, 0.0 }
 0x10a   :  { %89 = vrot.lane.b32.xlu1 %v85_v10, %s233_s0  ;;  %108 = vmatpush.msra.mxu1 %v85_v10 }
 0x10d   :  { %v82_v18 = vpop.f32.mrf.mxu2 }
 0x112   :  { %86 = vrot.lane.b32.xlu1 %v85_v10, %s234_s1 }
 0x17c   :  { %v90_v12 = vpop.permute.xlu1 %89 }
 0x17d   :  { %v91_v13 = vmul.f32 %v90_v12, %v47_v2 }
 0x17f   :  { %109 = vmatpush.msra.mxu1 %v91_v13 }
 0x184   :  { %v87_v14 = vpop.permute.xlu1 %86 }
 0x185   :  { %v88_v15 = vmul.f32 %v87_v14, %v46_v5 }
 0x187   :  { %110 = vmatpush.msra.mxu1 %v88_v15 }
 0x188   :  { %139 = vmatmul.msk.f32.vlgmr.msra.gmra.mxu1 %vm55_vm0, %v44_v16 }
 0x205   :  { %v112_v17 = vpop.f32.mrf.mxu1 }
 0x206   :  { %v115_v19 = vmax.f32 %v112_v17, 0.0 }
 0x208   :  { %v116_v20 = vadd.f32 %v115_v19, %v82_v18 }
 0x20a   :  { %v117_v21 = vmax.f32 %v116_v20, 0.0 }
 0x20c   :  { %118 = vst [vmem:[#allocation7] sm:$0xff] %v117_v21 }
 0x20d   :  { %129 = dma.vmem_to_hbm [thread:$0]  %s125_s22, 128, %s127_s25, [#allocation4]  }
 0x20e   :  { %227 = dma.done.wait [#allocation4], 128  }
 0x20f   :  { %228 = vsyncadd [#allocation4], 4294967168 }
 0x210   :  { %134 = vsyncpa [#allocation3], 1 }
 0x211   :  { %135 = vsyncpa [#allocation6], 1 }
 0x212   :  { %136 = vsyncpa [#allocation4], 1 }

</bundles_post_ra>
